<compile_context>
chip_gen: v7x
topology: tpu7x:2x2x1
jax: 0.10.0
libtpu: 0.0.40
codegen_flags: <defaults>
</compile_context>

<pallas_src>
import jax
import jax.numpy as jnp
from jax.experimental import pallas as pl
from jax.experimental.pallas import tpu as pltpu


def _round_up(x, m):
    return ((x + m - 1) // m) * m


def _vmem_budget_bytes():
    cap = 64 * 1024 * 1024  # conservative fallback (v7x per-TC VMEM)
    try:
        info = pltpu.get_tpu_info()
        cap = int(getattr(info, "vmem_capacity_bytes", cap))
    except Exception:
        pass
    # Leave headroom for compiler-managed staging (critical on v7x's 64 MiB);
    # on v5e/v6e (128 MiB) this allows >64 MiB for resident weights.
    return min(int(cap * 0.8), 110 * 1024 * 1024)


# ---------------------------------------------------------------------------
# Kernels
# ---------------------------------------------------------------------------
def _ffn_resident_kernel(x_ref, w1_ref, w2_ref, o_ref):
    """Weights fully VMEM-resident; grid iterates over row tiles only."""
    # In-kernel cast to the MXU compute dtype (hides under the matmul).
    x = x_ref[...].astype(w1_ref.dtype)
    h = jnp.dot(x, w1_ref[...], preferred_element_type=jnp.float32)
    h = jnp.maximum(h, 0.0)                       # ReLU; Dropout(eval) = identity
    out = jnp.dot(h.astype(w2_ref.dtype), w2_ref[...],
                  preferred_element_type=jnp.float32)
    o_ref[...] = out.astype(o_ref.dtype)          # final Dropout(eval) = identity


def _ffn_stream_kernel_f32out(x_ref, w1_ref, w2_ref, o_ref):
    """Streaming ff_dim chunks; accumulates directly into the f32 output tile."""
    k = pl.program_id(1)

    @pl.when(k == 0)
    def _():
        o_ref[...] = jnp.zeros_like(o_ref)

    x = x_ref[...].astype(w1_ref.dtype)
    h = jnp.maximum(jnp.dot(x, w1_ref[...], preferred_element_type=jnp.float32),
                    0.0)
    o_ref[...] += jnp.dot(h.astype(w2_ref.dtype), w2_ref[...],
                          preferred_element_type=jnp.float32)


def _ffn_stream_kernel_scratch(x_ref, w1_ref, w2_ref, o_ref, acc_ref):
    """Streaming ff_dim chunks; f32 scratch accumulator (non-f32 outputs)."""
    k = pl.program_id(1)

    @pl.when(k == 0)
    def _():
        acc_ref[...] = jnp.zeros_like(acc_ref)

    x = x_ref[...].astype(w1_ref.dtype)
    h = jnp.maximum(jnp.dot(x, w1_ref[...], preferred_element_type=jnp.float32),
                    0.0)
    acc_ref[...] += jnp.dot(h.astype(w2_ref.dtype), w2_ref[...],
                            preferred_element_type=jnp.float32)

    @pl.when(k == pl.num_programs(1) - 1)
    def _():
        o_ref[...] = acc_ref[...].astype(o_ref.dtype)


# ---------------------------------------------------------------------------
# Wrapper
# ---------------------------------------------------------------------------
def poswise_feed_forward(x, w1, w2, *, compute_dtype=jnp.bfloat16,
                         tile_m=512, tile_f=1024, force_streaming=False):
    """x: (B, S, d_model); w1: (d_model, ff_dim); w2: (ff_dim, d_model).

    Weights are stored pre-transposed as (in_features, out_features) so the
    kernel performs plain row-major MXU matmuls.
    """
    B, S, D = x.shape
    F = w1.shape[1]
    assert w1.shape == (D, F) and w2.shape == (F, D)
    out_dtype = x.dtype
    x_itemsize = jnp.dtype(x.dtype).itemsize
    c_itemsize = jnp.dtype(compute_dtype).itemsize
    o_itemsize = jnp.dtype(out_dtype).itemsize

    M = B * S
    x2d = x.reshape(M, D)                      # no dtype cast, no D padding

    vmem_limit = _vmem_budget_bytes()

    # --- row tiling --------------------------------------------------------
    # A full-dim block is always legal, so small M needs no padding at all.
    tm = M if M <= tile_m else tile_m
    Mp = _round_up(M, tm)
    if Mp != M:
        # Zero rows are exact for bias-free linears; sliced off below.
        x2d = jnp.pad(x2d, ((0, Mp - M), (0, 0)))
    n_mtiles = Mp // tm

    # Weights in bf16 (halved DMA bytes, MXU-native); f32 accumulation.
    w1c = w1.astype(compute_dtype)
    w2c = w2.astype(compute_dtype)
    weight_bytes = 2 * D * F * c_itemsize

    # Conservative VMEM estimate for the resident variant: weights counted 2x
    # for buffering, double-buffered x/out tiles, h in f32 + its bf16 copy.
    resident_vmem = (2 * weight_bytes
                     + 2 * tm * D * x_itemsize
                     + 2 * tm * D * o_itemsize
                     + tm * F * 4 + tm * F * c_itemsize)
    use_resident = (not force_streaming) and resident_vmem <= vmem_limit

    if use_resident:
        # ------------------------- resident mode ---------------------------
        cost = pl.CostEstimate(
            flops=4 * Mp * D * F,
            transcendentals=0,
            bytes_accessed=(Mp * D * x_itemsize + weight_bytes
                            + Mp * D * o_itemsize),
        )
        out2d = pl.pallas_call(
            _ffn_resident_kernel,
            out_shape=jax.ShapeDtypeStruct((Mp, D), out_dtype),
            grid_spec=pltpu.PrefetchScalarGridSpec(
                num_scalar_prefetch=0,
                grid=(n_mtiles,),
                in_specs=[
                    pl.BlockSpec((tm, D), lambda i: (i, 0)),   # x row tile
                    pl.BlockSpec((D, F), lambda i: (0, 0)),    # W1: DMA'd once
                    pl.BlockSpec((F, D), lambda i: (0, 0)),    # W2: DMA'd once
                ],
                out_specs=pl.BlockSpec((tm, D), lambda i: (i, 0)),
            ),
            compiler_params=pltpu.CompilerParams(
                dimension_semantics=("parallel",),
                vmem_limit_bytes=vmem_limit,
            ),
            cost_estimate=cost,
        )(x2d, w1c, w2c)
        return out2d[:M].reshape(B, S, D)

    # --------------------------- streaming mode -----------------------------
    tf = min(tile_f, _round_up(F, 128))

    def _stream_vmem(tf_):
        return (2 * 2 * D * tf_ * c_itemsize           # W1/W2 chunks, double-buffered
                + 2 * tm * D * x_itemsize              # x tile
                + 2 * tm * D * o_itemsize + tm * D * 4 # out tile (+acc)
                + tm * tf_ * 4 + tm * tf_ * c_itemsize)  # h f32 + bf16 copy

    while tf > 128 and _stream_vmem(tf) > vmem_limit:
        tf //= 2
    Fp = _round_up(F, tf)
    if Fp != F:
        # Zero padding is exact: ReLU(0)=0 and the padded W2 rows are zero.
        w1c = jnp.pad(w1c, ((0, 0), (0, Fp - F)))
        w2c = jnp.pad(w2c, ((0, Fp - F), (0, 0)))
    n_ftiles = Fp // tf

    grid = (n_mtiles, n_ftiles)
    cost = pl.CostEstimate(
        flops=4 * Mp * D * Fp,
        transcendentals=0,
        bytes_accessed=(Mp * D * x_itemsize
                        + n_mtiles * 2 * D * Fp * c_itemsize  # weights re-streamed per M tile
                        + Mp * D * o_itemsize),
    )
    in_specs = [
        pl.BlockSpec((tm, D), lambda i, k: (i, 0)),   # x row tile
        pl.BlockSpec((D, tf), lambda i, k: (0, k)),   # W1 chunk (streams)
        pl.BlockSpec((tf, D), lambda i, k: (k, 0)),   # W2 chunk (streams)
    ]
    out_spec = pl.BlockSpec((tm, D), lambda i, k: (i, 0))
    params = pltpu.CompilerParams(
        dimension_semantics=("parallel", "arbitrary"),
        vmem_limit_bytes=vmem_limit,
    )

    if jnp.dtype(out_dtype) == jnp.dtype(jnp.float32):
        out2d = pl.pallas_call(
            _ffn_stream_kernel_f32out,
            out_shape=jax.ShapeDtypeStruct((Mp, D), out_dtype),
            grid_spec=pltpu.PrefetchScalarGridSpec(
                num_scalar_prefetch=0, grid=grid,
                in_specs=in_specs, out_specs=out_spec),
            compiler_params=params, cost_estimate=cost,
        )(x2d, w1c, w2c)
    else:
        out2d = pl.pallas_call(
            _ffn_stream_kernel_scratch,
            out_shape=jax.ShapeDtypeStruct((Mp, D), out_dtype),
            grid_spec=pltpu.PrefetchScalarGridSpec(
                num_scalar_prefetch=0, grid=grid,
                in_specs=in_specs, out_specs=out_spec,
                scratch_shapes=[pltpu.VMEM((tm, D), jnp.float32)]),
            compiler_params=params, cost_estimate=cost,
        )(x2d, w1c, w2c)
    return out2d[:M].reshape(B, S, D)


if __name__ == "__main__":
    # config: d_model=32, feed_forward_dim=64; drop_out_raito irrelevant (eval)
    # TODO(synk): Dropout is implemented as identity (inference mode); no RNG mask.
    B, S, D, F = 2, 8, 32, 64

    key = jax.random.PRNGKey(0)
    kx, k1, k2 = jax.random.split(key, 3)

    x = jax.random.normal(kx, (B, S, D), dtype=jnp.float32)
    # nn.Linear(D, F, bias=False) weight is (F, D); we store the transpose
    # (D, F) so the kernel computes x @ W1 directly. Deterministic init.
    bound1 = 1.0 / (D ** 0.5)
    bound2 = 1.0 / (F ** 0.5)
    w1 = jax.random.uniform(k1, (D, F), jnp.float32, -bound1, bound1)
    w2 = jax.random.uniform(k2, (F, D), jnp.float32, -bound2, bound2)

    # Resident-weight path (chosen automatically for these tiny weights).
    out = jax.block_until_ready(poswise_feed_forward(x, w1, w2))
    assert out.shape == (B, S, D)

    # Also exercise the streaming (ff_dim-tiled) fallback path for coverage.
    out_stream = jax.block_until_ready(
        poswise_feed_forward(x, w1, w2, force_streaming=True))

    # Reference that mirrors the kernel's bf16-input / f32-accumulate math.
    xb = x.reshape(-1, D).astype(jnp.bfloat16).astype(jnp.float32)
    w1b = w1.astype(jnp.bfloat16).astype(jnp.float32)
    w2b = w2.astype(jnp.bfloat16).astype(jnp.float32)
    h = jnp.maximum(xb @ w1b, 0.0)
    ref = (h.astype(jnp.bfloat16).astype(jnp.float32) @ w2b).reshape(B, S, D)
    assert jnp.allclose(out, ref, atol=1e-2, rtol=1e-2)
    assert jnp.allclose(out_stream, ref, atol=1e-2, rtol=1e-2)

    # Sanity vs pure-f32 math (loose tolerance for the bf16-matmul delta).
    ref_f32 = (jnp.maximum(x.reshape(-1, D) @ w1, 0.0) @ w2).reshape(B, S, D)
    assert jnp.allclose(out, ref_f32, atol=5e-2, rtol=5e-2)

    print("KERNEL_OK")
</pallas_src>

<mosaic_0001>
module attributes {stable_mosaic.version = 11 : i64} {
  func.func @_ffn_resident_kernel(%arg0: i32, %arg1: memref<16x32xf32, #tpu.memory_space<vmem>>, %arg2: memref<32x64xbf16, #tpu.memory_space<vmem>>, %arg3: memref<64x32xbf16, #tpu.memory_space<vmem>>, %arg4: memref<16x32xf32, #tpu.memory_space<vmem>>) attributes {dimension_semantics = [#tpu.dimension_semantics<parallel>], iteration_bounds = array<i64: 1>, scalar_prefetch = 0 : i64, scratch_operands = 0 : i64, tpu.core_type = #tpu.core_type<tc>, window_params = [{transform_indices = @transform_0, window_bounds = array<i64: 16, 32>}, {pipeline_mode = #tpu.pipeline_mode<synchronous>, transform_indices = @transform_1, window_bounds = array<i64: 32, 64>}, {pipeline_mode = #tpu.pipeline_mode<synchronous>, transform_indices = @transform_2, window_bounds = array<i64: 64, 32>}, {transform_indices = @transform_3, window_bounds = array<i64: 16, 32>}]} {
    %c0 = arith.constant 0 : index
    %c0_0 = arith.constant 0 : index
    %0 = vector.load %arg1[%c0, %c0_0] : memref<16x32xf32, #tpu.memory_space<vmem>>, vector<16x32xf32>
    %1 = arith.truncf %0 : vector<16x32xf32> to vector<16x32xbf16>
    %c0_1 = arith.constant 0 : index
    %c0_2 = arith.constant 0 : index
    %2 = vector.load %arg2[%c0_1, %c0_2] : memref<32x64xbf16, #tpu.memory_space<vmem>>, vector<32x64xbf16>
    %cst = arith.constant dense<0.000000e+00> : vector<16x64xf32>
    %3 = tpu.matmul %1, %2, %cst {dimension_numbers = #tpu.dot_dimension_numbers<[1], [0], [0], [1], [0, 0, 1, 1], [], []>} : vector<16x32xbf16>, vector<32x64xbf16>, vector<16x64xf32> -> vector<16x64xf32>
    %cst_3 = arith.constant 0.000000e+00 : f32
    %4 = vector.broadcast %cst_3 : f32 to vector<16x64xf32>
    %5 = arith.maximumf %3, %4 : vector<16x64xf32>
    %6 = arith.truncf %5 : vector<16x64xf32> to vector<16x64xbf16>
    %c0_4 = arith.constant 0 : index
    %c0_5 = arith.constant 0 : index
    %7 = vector.load %arg3[%c0_4, %c0_5] : memref<64x32xbf16, #tpu.memory_space<vmem>>, vector<64x32xbf16>
    %cst_6 = arith.constant dense<0.000000e+00> : vector<16x32xf32>
    %8 = tpu.matmul %6, %7, %cst_6 {dimension_numbers = #tpu.dot_dimension_numbers<[1], [0], [0], [1], [0, 0, 1, 1], [], []>} : vector<16x64xbf16>, vector<64x32xbf16>, vector<16x32xf32> -> vector<16x32xf32>
    %c0_7 = arith.constant 0 : index
    %c0_8 = arith.constant 0 : index
    %9 = vector.load %arg4[%c0_7, %c0_8] : memref<16x32xf32, #tpu.memory_space<vmem>>, vector<16x32xf32>
    tpu.vector_store %arg4[%c0_7, %c0_8], %8 {strides = array<i32>} : memref<16x32xf32, #tpu.memory_space<vmem>>, vector<16x32xf32>,
    return
  }
  func.func @transform_0(%arg0: i32) -> (i32, i32) {
    %c0_i32 = arith.constant 0 : i32
    %c0_i32_0 = arith.constant 0 : i32
    return %arg0, %c0_i32 : i32, i32
  }
  func.func @transform_1(%arg0: i32) -> (i32, i32) {
    %c0_i32 = arith.constant 0 : i32
    %c0_i32_0 = arith.constant 0 : i32
    %c0_i32_1 = arith.constant 0 : i32
    return %c0_i32, %c0_i32_0 : i32, i32
  }
  func.func @transform_2(%arg0: i32) -> (i32, i32) {
    %c0_i32 = arith.constant 0 : i32
    %c0_i32_0 = arith.constant 0 : i32
    %c0_i32_1 = arith.constant 0 : i32
    return %c0_i32, %c0_i32_0 : i32, i32
  }
  func.func @transform_3(%arg0: i32) -> (i32, i32) {
    %c0_i32 = arith.constant 0 : i32
    %c0_i32_0 = arith.constant 0 : i32
    return %arg0, %c0_i32 : i32, i32
  }
}

</mosaic_0001>

<bundles_post_ra>
// kernel: tpu_custom_call.1
= control target key start
LH: loop header
LB: loop body
LE: loop exit
PB: predicated region body
PF: predicated region fallthrough
CT: control target
= control target key end

     0   :  { %v249_v1 = vmov 0.0   ;;  %vm250_vm0 = vmmov 0   ;;  %vm35_vm1 = vcmask 261120   ;;  %s313_s0 = inlined_call_operand.vmem [shape: f32[16,32], index: 0, kind: input, shape index: {}]   ;;  %s314_s1 = inlined_call_operand.vmem [shape: bf16[32,64], index: 1, kind: input, shape index: {}]   ;;  %s315_s2 = inlined_call_operand.vmem [shape: bf16[64,32], index: 2, kind: input, shape index: {}]   ;;  %s316_s3 = inlined_call_operand.hbm [shape: f32[16,32], index: 3, kind: output, shape index: {}]  }
   0x1   :  { %v219_v0 = vld [vmem:[%s314_s1] sm:$0xff]   ;;  %194 = vmatprep.subr.bf16.mxu0 %v249_v1  ;;  %v220_v2 = vld [vmem:[%s314_s1 + $0x8] sm:$0xff]   ;;  %202 = vmatprep.subr.bf16.mxu1 %v249_v1 }
   0x2   :  { %195 = vmatpush3.bf16.msra.mxu0 %v219_v0  ;;  %198 = vmatprep.mubr.msk.bf16.mxu0 %vm250_vm0, %v249_v1  ;;  %v16_v3 = vld [vmem:[%s313_s0] sm:$0xff]  ;;  %v17_v4 = vld [vmem:[%s313_s0 + $0x8] sm:$0xff] }
   0x3   :  { %196 = vmatprep.subr.bf16.mxu0 %v249_v1  ;;  %v221_v5 = vld [vmem:[%s315_s2] sm:$0xff]   ;;  %210 = vmatprep.mubr.msk.bf16.mxu1 %vm250_vm0, %v249_v1  ;;  %v222_v6 = vld [vmem:[%s315_s2 + $0x8] sm:$0xff]   ;;  %v18_v7 = vpack.c.bf16 %v17_v4, %v16_v3 }
   0x4   :  { %203 = vmatpush3.bf16.msra.mxu1 %v221_v5 }
   0x5   :  { %204 = vmatprep.subr.bf16.mxu1 %v249_v1 }
   0x6   :  { %197 = vmatpush3.bf16.msra.mxu0 %v220_v2 }
   0x7   :  { %8 = vsyncpa [#allocation3], 0  ;;  %v223_v8 = vld [vmem:[%s315_s2 + $0x10] sm:$0xff]   ;;  %v224_v9 = vld [vmem:[%s315_s2 + $0x18] sm:$0xff]   ;;  %vm115_vm2 = vcmask 523264   ;;  %s251_s26 = smov [#allocation2]  }
   0x8   :  { %205 = vmatpush3.bf16.msra.mxu1 %v222_v6  ;;  %s167_s27 = sshll.u32 %s251_s26, 4  ;;  %s168_s27 = int_to_ptr.vmem [resolvable:$true] %s167_s27 }
   0x9   :  { %199 = vmatmul.mubr.msk.bf16.vlgmr.msra.gmra.mrb[0].mxu0 %vm35_vm1, %v18_v7  ;;  %206 = vmatprep.subr.bf16.mxu1 %v249_v1  ;;  %s225_s2 = scalar_lea.vmem %s168_s27, 256  ;;  %p230_p1 = scmp.lt.s32.totalorder %s168_s27, %s168_s27 }
   0xa   :  { %p226_p0 = scmp.ne.s32.totalorder %s168_s27, %s225_s2  ;;  %p231_p2 = scmp.lt.s32.totalorder %s225_s2, %s225_s2 }
   0xc   :  { %207 = vmatpush3.bf16.msra.mxu1 %v223_v8  ;;  %p232_p3 = por %p231_p2, %p230_p1 }
   0xd   :  { %208 = vmatprep.subr.bf16.mxu1 %v249_v1 }
   0xe   :  { %p233_p4 = pnand %p232_p3, %p226_p0 }
  0x10   :  { %209 = vmatpush3.bf16.msra.mxu1 %v224_v9 }
  0xdc   :  { %v73_v10 = vpop.f32.mrb[0].mxu0 }
  0xdd   :  { %v200_v11 = vpop.f32.mrb[1].mxu0  ;;  %v80_v13 = vmax.f32 %v73_v10, 0.0 }
  0xde   :  { %v76_v12 = vpop.f32.mrb[2].mxu0 }
  0xdf   :  { %v81_v14 = vmax.f32 %v76_v12, 0.0  ;;  %v201_v15 = vpop.f32.mrb[3].mxu0 }
  0xe1   :  { %v82_v16 = vpack.c.bf16 %v81_v14, %v80_v13 }
  0xe3   :  { %211 = vmatmul.mubr.msk.bf16.vlgmr.msra.gmra.mrb[0].mxu1 %vm115_vm2, %v82_v16 }
 0x1b6   :  { %v153_v17 = vpop.f32.mrb[0].mxu1 }
 0x1b7   :  { %160 = vst.msk [vmem:[#allocation2] sm:$0xff] %vm35_vm1, %v153_v17  ;;  %v212_v18 = vpop.f32.mrb[1].mxu1 }
 0x1b8   :  { %v156_v19 = vpop.f32.mrb[2].mxu1 }
 0x1b9   :  { %161 = vst.msk [vmem:[#allocation2 + $0x8] sm:$0xff] %vm35_vm1, %v156_v19  ;;  %v213_v20 = vpop.f32.mrb[3].mxu1 }
 0x1ba   :  { %236 = shalt.err (!%p233_p4)
}
 0x1bb   :  { %s237_s30 = scalar_lea.hbm %s316_s3, 256 }
 0x1bc   :  { %p238_p5 = scmp.ne.s32.totalorder %s316_s3, %s237_s30  ;;  %p241_p6 = scmp.lt.u32.totalorder %s237_s30, %s316_s3 }
 0x1be   :  { %p243_p7 = pnand %p241_p6, %p238_p5 }
 0x1c0   :  { %246 = shalt.err (!%p243_p7)
}
 0x1c1   :  { %s252_s8 = smov 128   ;;  %s253_s9 = smov 8  }
 0x1c2   :  { %173 = dma.vmem_to_hbm [thread:$0]  %s168_s27, 256, %s316_s3, [#allocation3], %s252_s8, %s252_s8, %s253_s9  }
 0x1c3   :  { %247 = dma.done.wait [#allocation3], 256  }
 0x1c4   :  { %248 = vsyncadd [#allocation3], 4294967040 }
 0x1c5   :  { %177 = vsyncpa [#allocation3], 1 }

</bundles_post_ra>
